<compile_context>
chip_gen: v5e
topology: v5e:2x2
jax: 0.10.0
libtpu: 0.0.40
codegen_flags: <defaults>
</compile_context>

<pallas_src>
import jax
import jax.numpy as jnp
from jax.experimental import pallas as pl
from jax.experimental.pallas import tpu as pltpu


def dqn_mlp_kernel(x_ref, w1_ref, b1_ref, w2_ref, b2_ref, w3_ref, b3_ref, o_ref):
    # x / w* are bf16 (MXU-native); biases are f32; all matmuls accumulate in f32.
    x = x_ref[...]                                                        # (TM, in) bf16
    h1 = jnp.dot(x, w1_ref[...], preferred_element_type=jnp.float32) + b1_ref[...]
    h1 = jnp.maximum(h1, 0.0).astype(jnp.bfloat16)                        # relu(fc1)
    h2 = jnp.dot(h1, w2_ref[...], preferred_element_type=jnp.float32) + b2_ref[...]
    h2 = jnp.maximum(h2, 0.0).astype(jnp.bfloat16)                        # relu(fc2)
    y = jnp.dot(h2, w3_ref[...], preferred_element_type=jnp.float32) + b3_ref[...]
    o_ref[...] = y.astype(o_ref.dtype)                                    # fc3 -> bf16 store


def _round_up(n, m):
    return ((n + m - 1) // m) * m


def _choose_tm(batch, tm_max):
    """Adaptive batch tile: 16-row granularity, capped at tm_max, preferring
    >=2 grid steps so both v7x TensorCores get work when the batch allows."""
    b = _round_up(batch, 16)
    if b <= 16:
        return b
    return min(tm_max, _round_up(b // 2, 16))


def prepare_params(params):
    """One-time parameter prep (hoisted out of the forward hot path):
    cast weights to bf16 for the MXU; biases stay f32."""
    w1, b1, w2, b2, w3, b3 = params
    return (w1.astype(jnp.bfloat16), b1,
            w2.astype(jnp.bfloat16), b2,
            w3.astype(jnp.bfloat16), b3)


def dqn_forward(x, prepared_params, *, tm_max=256):
    """x: (B, input_size) f32.  prepared_params: output of prepare_params().
    Returns (B, output_size) f32, matching DQNetwork.forward."""
    w1, b1, w2, b2, w3, b3 = prepared_params
    B, in_size = x.shape
    out_size = w3.shape[1]

    tm = _choose_tm(B, tm_max)
    b_pad = _round_up(B, tm)

    xb = x.astype(jnp.bfloat16)
    if b_pad != B:
        xb = jnp.pad(xb, ((0, b_pad - B), (0, 0)))

    grid = (b_pad // tm,)
    # Constant index_map -> weight/bias blocks stay resident in VMEM across the grid.
    resident = lambda a: pl.BlockSpec(a.shape, lambda i: (0,) * a.ndim)

    out = pl.pallas_call(
        dqn_mlp_kernel,
        # Unpadded bf16 output: (tm, out_size) tiles are contiguous in HBM, so
        # the writeback DMA is small and dense; no feature-dim slice is needed.
        out_shape=jax.ShapeDtypeStruct((b_pad, out_size), jnp.bfloat16),
        grid=grid,
        in_specs=[
            pl.BlockSpec((tm, in_size), lambda i: (i, 0)),   # x: pipelined over batch tiles
            resident(w1), resident(b1),
            resident(w2), resident(b2),
            resident(w3), resident(b3),
        ],
        out_specs=pl.BlockSpec((tm, out_size), lambda i: (i, 0)),
        compiler_params=pltpu.CompilerParams(dimension_semantics=("parallel",)),
    )(xb, w1, b1, w2, b2, w3, b3)

    # Drop batch padding (no-op when B % tm == 0) and return f32 like the
    # PyTorch module; under jit these fuse with the call.
    return out[:B].astype(jnp.float32)


def init_params(key, input_size, output_size, hidden=128):
    # PyTorch nn.Linear default init: U(-1/sqrt(fan_in), 1/sqrt(fan_in)).
    def linear(k, fan_in, fan_out):
        kw, kb = jax.random.split(k)
        bound = 1.0 / jnp.sqrt(fan_in)
        w = jax.random.uniform(kw, (fan_in, fan_out), jnp.float32, -bound, bound)
        b = jax.random.uniform(kb, (1, fan_out), jnp.float32, -bound, bound)
        return w, b

    k1, k2, k3 = jax.random.split(key, 3)
    w1, b1 = linear(k1, input_size, hidden)
    w2, b2 = linear(k2, hidden, hidden)
    w3, b3 = linear(k3, hidden, output_size)
    return (w1, b1, w2, b2, w3, b3)


if __name__ == "__main__":
    key = jax.random.PRNGKey(0)
    kx, kp = jax.random.split(key)

    # Small DQN-style workload: 64 states of dim 32, 8 actions.
    # tile chooser -> tm=32, grid of 2 batch tiles (exercises the pipelined,
    # parallel batch axis).
    batch, input_size, output_size = 64, 32, 8
    x = jax.random.normal(kx, (batch, input_size), dtype=jnp.float32)
    params = init_params(kp, input_size, output_size)

    prepared = prepare_params(params)   # hoisted, one-time weight prep (bf16 cast)
    fwd = jax.jit(dqn_forward)          # per-call pad/cast/slice fuse into one dispatch

    out = jax.block_until_ready(fwd(x, prepared))

    # Pure-JAX f32 reference; tolerance relaxed because matmul inputs and the
    # final store are bf16 (accumulation is still f32).
    w1, b1, w2, b2, w3, b3 = params
    ref = jnp.maximum(x @ w1 + b1, 0.0)
    ref = jnp.maximum(ref @ w2 + b2, 0.0)
    ref = ref @ w3 + b3
    assert out.shape == (batch, output_size)
    assert jnp.allclose(out, ref, atol=3e-2, rtol=3e-2), "mismatch vs reference"

    print("KERNEL_OK")
</pallas_src>

<mosaic_0001>
module attributes {stable_mosaic.version = 11 : i64} {
  func.func @dqn_mlp_kernel(%arg0: i32, %arg1: memref<32x32xbf16, #tpu.memory_space<vmem>>, %arg2: memref<32x128xbf16, #tpu.memory_space<vmem>>, %arg3: memref<1x128xf32, #tpu.memory_space<vmem>>, %arg4: memref<128x128xbf16, #tpu.memory_space<vmem>>, %arg5: memref<1x128xf32, #tpu.memory_space<vmem>>, %arg6: memref<128x8xbf16, #tpu.memory_space<vmem>>, %arg7: memref<1x8xf32, #tpu.memory_space<vmem>>, %arg8: memref<32x8xbf16, #tpu.memory_space<vmem>>) attributes {dimension_semantics = [#tpu.dimension_semantics<parallel>], iteration_bounds = array<i64: 2>, scalar_prefetch = 0 : i64, scratch_operands = 0 : i64, tpu.core_type = #tpu.core_type<tc>, window_params = [{transform_indices = @transform_0, window_bounds = array<i64: 32, 32>}, {pipeline_mode = #tpu.pipeline_mode<synchronous>, transform_indices = @transform_1, window_bounds = array<i64: 32, 128>}, {pipeline_mode = #tpu.pipeline_mode<synchronous>, transform_indices = @transform_2, window_bounds = array<i64: 1, 128>}, {pipeline_mode = #tpu.pipeline_mode<synchronous>, transform_indices = @transform_3, window_bounds = array<i64: 128, 128>}, {pipeline_mode = #tpu.pipeline_mode<synchronous>, transform_indices = @transform_4, window_bounds = array<i64: 1, 128>}, {pipeline_mode = #tpu.pipeline_mode<synchronous>, transform_indices = @transform_5, window_bounds = array<i64: 128, 8>}, {pipeline_mode = #tpu.pipeline_mode<synchronous>, transform_indices = @transform_6, window_bounds = array<i64: 1, 8>}, {transform_indices = @transform_7, window_bounds = array<i64: 32, 8>}]} {
    %c0 = arith.constant 0 : index
    %c0_0 = arith.constant 0 : index
    %0 = vector.load %arg1[%c0, %c0_0] : memref<32x32xbf16, #tpu.memory_space<vmem>>, vector<32x32xbf16>
    %c0_1 = arith.constant 0 : index
    %c0_2 = arith.constant 0 : index
    %1 = vector.load %arg2[%c0_1, %c0_2] : memref<32x128xbf16, #tpu.memory_space<vmem>>, vector<32x128xbf16>
    %cst = arith.constant dense<0.000000e+00> : vector<32x128xf32>
    %2 = tpu.matmul %0, %1, %cst {dimension_numbers = #tpu.dot_dimension_numbers<[1], [0], [0], [1], [0, 0, 1, 1], [], []>} : vector<32x32xbf16>, vector<32x128xbf16>, vector<32x128xf32> -> vector<32x128xf32>
    %c0_3 = arith.constant 0 : index
    %c0_4 = arith.constant 0 : index
    %3 = vector.load %arg3[%c0_3, %c0_4] : memref<1x128xf32, #tpu.memory_space<vmem>>, vector<1x128xf32>
    %4 = vector.broadcast %3 : vector<1x128xf32> to vector<32x128xf32>
    %5 = arith.addf %2, %4 : vector<32x128xf32>
    %cst_5 = arith.constant 0.000000e+00 : f32
    %6 = vector.broadcast %cst_5 : f32 to vector<32x128xf32>
    %7 = arith.maximumf %5, %6 : vector<32x128xf32>
    %8 = arith.truncf %7 : vector<32x128xf32> to vector<32x128xbf16>
    %c0_6 = arith.constant 0 : index
    %c0_7 = arith.constant 0 : index
    %9 = vector.load %arg4[%c0_6, %c0_7] : memref<128x128xbf16, #tpu.memory_space<vmem>>, vector<128x128xbf16>
    %cst_8 = arith.constant dense<0.000000e+00> : vector<32x128xf32>
    %10 = tpu.matmul %8, %9, %cst_8 {dimension_numbers = #tpu.dot_dimension_numbers<[1], [0], [0], [1], [0, 0, 1, 1], [], []>} : vector<32x128xbf16>, vector<128x128xbf16>, vector<32x128xf32> -> vector<32x128xf32>
    %c0_9 = arith.constant 0 : index
    %c0_10 = arith.constant 0 : index
    %11 = vector.load %arg5[%c0_9, %c0_10] : memref<1x128xf32, #tpu.memory_space<vmem>>, vector<1x128xf32>
    %12 = vector.broadcast %11 : vector<1x128xf32> to vector<32x128xf32>
    %13 = arith.addf %10, %12 : vector<32x128xf32>
    %cst_11 = arith.constant 0.000000e+00 : f32
    %14 = vector.broadcast %cst_11 : f32 to vector<32x128xf32>
    %15 = arith.maximumf %13, %14 : vector<32x128xf32>
    %16 = arith.truncf %15 : vector<32x128xf32> to vector<32x128xbf16>
    %c0_12 = arith.constant 0 : index
    %c0_13 = arith.constant 0 : index
    %17 = vector.load %arg6[%c0_12, %c0_13] : memref<128x8xbf16, #tpu.memory_space<vmem>>, vector<128x8xbf16>
    %cst_14 = arith.constant dense<0.000000e+00> : vector<32x8xf32>
    %18 = tpu.matmul %16, %17, %cst_14 {dimension_numbers = #tpu.dot_dimension_numbers<[1], [0], [0], [1], [0, 0, 1, 1], [], []>} : vector<32x128xbf16>, vector<128x8xbf16>, vector<32x8xf32> -> vector<32x8xf32>
    %c0_15 = arith.constant 0 : index
    %c0_16 = arith.constant 0 : index
    %19 = vector.load %arg7[%c0_15, %c0_16] : memref<1x8xf32, #tpu.memory_space<vmem>>, vector<1x8xf32>
    %20 = vector.broadcast %19 : vector<1x8xf32> to vector<32x8xf32>
    %21 = arith.addf %18, %20 : vector<32x8xf32>
    %22 = arith.truncf %21 : vector<32x8xf32> to vector<32x8xbf16>
    %c0_17 = arith.constant 0 : index
    %c0_18 = arith.constant 0 : index
    %23 = vector.load %arg8[%c0_17, %c0_18] : memref<32x8xbf16, #tpu.memory_space<vmem>>, vector<32x8xbf16>
    tpu.vector_store %arg8[%c0_17, %c0_18], %22 {strides = array<i32>} : memref<32x8xbf16, #tpu.memory_space<vmem>>, vector<32x8xbf16>,
    return
  }
  func.func @transform_0(%arg0: i32) -> (i32, i32) {
    %c0_i32 = arith.constant 0 : i32
    %c0_i32_0 = arith.constant 0 : i32
    return %arg0, %c0_i32 : i32, i32
  }
  func.func @transform_1(%arg0: i32) -> (i32, i32) {
    %c0_i32 = arith.constant 0 : i32
    %c0_i32_0 = arith.constant 0 : i32
    %c0_i32_1 = arith.constant 0 : i32
    return %c0_i32, %c0_i32_0 : i32, i32
  }
  func.func @transform_2(%arg0: i32) -> (i32, i32) {
    %c0_i32 = arith.constant 0 : i32
    %c0_i32_0 = arith.constant 0 : i32
    %c0_i32_1 = arith.constant 0 : i32
    return %c0_i32, %c0_i32_0 : i32, i32
  }
  func.func @transform_3(%arg0: i32) -> (i32, i32) {
    %c0_i32 = arith.constant 0 : i32
    %c0_i32_0 = arith.constant 0 : i32
    %c0_i32_1 = arith.constant 0 : i32
    return %c0_i32, %c0_i32_0 : i32, i32
  }
  func.func @transform_4(%arg0: i32) -> (i32, i32) {
    %c0_i32 = arith.constant 0 : i32
    %c0_i32_0 = arith.constant 0 : i32
    %c0_i32_1 = arith.constant 0 : i32
    return %c0_i32, %c0_i32_0 : i32, i32
  }
  func.func @transform_5(%arg0: i32) -> (i32, i32) {
    %c0_i32 = arith.constant 0 : i32
    %c0_i32_0 = arith.constant 0 : i32
    %c0_i32_1 = arith.constant 0 : i32
    return %c0_i32, %c0_i32_0 : i32, i32
  }
  func.func @transform_6(%arg0: i32) -> (i32, i32) {
    %c0_i32 = arith.constant 0 : i32
    %c0_i32_0 = arith.constant 0 : i32
    %c0_i32_1 = arith.constant 0 : i32
    return %c0_i32, %c0_i32_0 : i32, i32
  }
  func.func @transform_7(%arg0: i32) -> (i32, i32) {
    %c0_i32 = arith.constant 0 : i32
    %c0_i32_0 = arith.constant 0 : i32
    return %arg0, %c0_i32 : i32, i32
  }
}

</mosaic_0001>

<bundles_post_ra>
// kernel: dqn_forward.1
= control target key start
LH: loop header
LB: loop body
LE: loop exit
PB: predicated region body
PF: predicated region fallthrough
CT: control target
= control target key end

     0   :  { %s782_s24 = smov 0   ;;  %s869_s0 = inlined_call_operand.vmem [shape: bf16[64,32], index: 0, kind: input, shape index: {}]   ;;  %s870_s1 = inlined_call_operand.vmem [shape: bf16[32,128], index: 1, kind: input, shape index: {}]   ;;  %s871_s2 = inlined_call_operand.vmem [shape: f32[1,128], index: 2, kind: input, shape index: {}]   ;;  %s872_s3 = inlined_call_operand.vmem [shape: bf16[128,128], index: 3, kind: input, shape index: {}]   ;;  %s873_s4 = inlined_call_operand.vmem [shape: f32[1,128], index: 4, kind: input, shape index: {}]   ;;  %s874_s5 = inlined_call_operand.vmem [shape: bf16[128,8], index: 5, kind: input, shape index: {}]   ;;  %s875_s6 = inlined_call_operand.vmem [shape: f32[1,8], index: 6, kind: input, shape index: {}]   ;;  %s876_s7 = inlined_call_operand.vmem [shape: bf16[64,8], index: 7, kind: output, shape index: {}]  }
   0x1 LB: > { %s594_s25 = sadd.s32 4294967295, %s740_s24   ;;  %p598_p0 = scmp.ge.s32.totalorder %s740_s24, 1  ;;  %s740_s24 = sphi %s782_s24, %s17_s24  }
   0x2   : > { %p238_p1 = scmp.lt.s32.totalorder %s740_s24, 3 }
   0x4   : > { %p239_p2 = pnand %p598_p0, %p238_p1 }
   0x5   : > { %s599_s28 = sshll.u32 (!%p239_p2), %s594_s25, 2 }
   0x6   : > { %242 = sbr.rel (%p239_p2) target bundleno = 466 (0x1d2), region = 48  ;;  %p271_p3 = scmp.lt.s32.totalorder (!%p239_p2), %s599_s28, 7 }
   0xb   : > { %v690_v0 = vld [vmem:[%s870_s1 + $0x8] sm:$0xff]  ;;  %v698_v1 = vld [vmem:[%s872_s3 + $0x38] sm:$0xff]  ;;  %v689_v2 = vld [vmem:[%s870_s1] sm:$0xff]  ;;  %s878_s28 = smov (!%p271_p3, %s599_s28), 7  ;;  %vm317_vm0 = vcmask 261120   ;;  %vm533_vm1 = vcmask 60416  }
   0xc   : > { %330 = vmatpush.bf16.msra.mxu0 %v690_v0  ;;  %417 = vmatpush.bf16.msra.mxu1 %v698_v1  ;;  %v697_v3 = vld [vmem:[%s872_s3 + $0x30] sm:$0xff]  ;;  %s600_s12 = sshll.u32 %s878_s28, 2  ;;  %v696_v4 = vld [vmem:[%s872_s3 + $0x28] sm:$0xff]  ;;  %v695_v6 = vld [vmem:[%s872_s3 + $0x20] sm:$0xff] }
   0xd   : > { %707 = vmatpush.bf16.msra.mxu3 %v698_v1  ;;  %s274_s15 = scalar_lea.vmem %s869_s0, %s600_s12  ;;  %v694_v8 = vld [vmem:[%s872_s3 + $0x18] sm:$0xff]  ;;  %v693_v9 = vld [vmem:[%s872_s3 + $0x10] sm:$0xff]  ;;  %v692_v10 = vld [vmem:[%s872_s3 + $0x8] sm:$0xff]  ;;  %s280_s11 = scalar_lea.vmem %s876_s7, %s600_s12 }
   0xe   : > { %v687_v5 = vld [vmem:[%s274_s15] sm:$0xff]  ;;  %v688_v7 = vld [vmem:[%s274_s15 + $0x8] sm:$0xff]  ;;  %v706_v12 = vld [vmem:[%s874_s5 + $0x38] sm:$0xff] }
   0xf   : > { %v691_v11 = vld [vmem:[%s872_s3] sm:$0xff]  ;;  %v705_v14 = vld [vmem:[%s874_s5 + $0x30] sm:$0xff]  ;;  %715 = vmatpush.bf16.msra.mxu2 %v706_v12  ;;  %v704_v16 = vld [vmem:[%s874_s5 + $0x28] sm:$0xff] }
  0x10   : > { %331 = vmatpush.bf16.msra.mxu0 %v689_v2  ;;  %418 = vmatpush.bf16.msra.mxu1 %v697_v3  ;;  %v731_v15 = vld [vmem:[%s871_s2] ss:$0 sm:$0xff]  ;;  %v702_v31 = vld [vmem:[%s874_s5 + $0x18] sm:$0xff]  ;;  %v701_v32 = vld [vmem:[%s874_s5 + $0x10] sm:$0xff] }
  0x11   : > { %708 = vmatpush.bf16.msra.mxu3 %v697_v3  ;;  %v703_v20 = vld [vmem:[%s874_s5 + $0x20] sm:$0xff]  ;;  %v700_v33 = vld [vmem:[%s874_s5 + $0x8] sm:$0xff] }
  0x12   : > { %v699_v34 = vld [vmem:[%s874_s5] sm:$0xff] }
  0x13   : > { %619 = vmatmul.msk.bf16.vlgmr.msra.gmra.mxu0 %vm317_vm0, %v687_v5  ;;  %716 = vmatpush.bf16.msra.mxu2 %v705_v14  ;;  %v732_v36 = vld [vmem:[%s873_s4] ss:$0 sm:$0xff] }
  0x14   : > { %419 = vmatpush.bf16.msra.mxu1 %v696_v4  ;;  %510 = vmatpush.bf16.msrb.mxu0 %v706_v12  ;;  %v733_v50 = vld [vmem:[%s875_s6] ss:$0 sm:$0xff] }
  0x15   : > { %709 = vmatpush.bf16.msra.mxu3 %v696_v4 }
  0x17   : > { %717 = vmatpush.bf16.msra.mxu2 %v704_v16 }
  0x18   : > { %420 = vmatpush.bf16.msra.mxu1 %v695_v6  ;;  %511 = vmatpush.bf16.msrb.mxu0 %v705_v14 }
  0x19   : > { %710 = vmatpush.bf16.msra.mxu3 %v695_v6 }
  0x1b   : > { %718 = vmatpush.bf16.msra.mxu2 %v703_v20 }
  0x1c   : > { %421 = vmatpush.bf16.msra.mxu1 %v694_v8  ;;  %512 = vmatpush.bf16.msrb.mxu0 %v704_v16 }
  0x1d   : > { %711 = vmatpush.bf16.msra.mxu3 %v694_v8 }
  0x1f   : > { %719 = vmatpush.bf16.msra.mxu2 %v702_v31 }
  0x20   : > { %422 = vmatpush.bf16.msra.mxu1 %v693_v9  ;;  %513 = vmatpush.bf16.msrb.mxu0 %v703_v20 }
  0x21   : > { %712 = vmatpush.bf16.msra.mxu3 %v693_v9 }
  0x23   : > { %620 = vmatmul.msk.bf16.gmra.mxu0 %vm317_vm0, %v688_v7  ;;  %720 = vmatpush.bf16.msra.mxu2 %v701_v32 }
  0x24   : > { %423 = vmatpush.bf16.msra.mxu1 %v692_v10  ;;  %514 = vmatpush.bf16.msrb.mxu0 %v702_v31 }
  0x25   : > { %713 = vmatpush.bf16.msra.mxu3 %v692_v10 }
  0x27   : > { %721 = vmatpush.bf16.msra.mxu2 %v700_v33 }
  0x28   : > { %424 = vmatpush.bf16.msra.mxu1 %v691_v11  ;;  %515 = vmatpush.bf16.msrb.mxu0 %v701_v32 }
  0x29   : > { %714 = vmatpush.bf16.msra.mxu3 %v691_v11 }
  0x2b   : > { %722 = vmatpush.bf16.msra.mxu2 %v699_v34 }
  0x2c   : > { %516 = vmatpush.bf16.msrb.mxu0 %v700_v33 }
  0x30   : > { %517 = vmatpush.bf16.msrb.mxu0 %v699_v34 }
  0x90   : > { %v333_v13 = vpop.f32.mrf.mxu0 }
  0x91   : > { %v334_v17 = vadd.f32 %v731_v15, %v333_v13 }
  0x93   : > { %v343_v21 = vmax.f32 %v334_v17, 0.0 }
  0x98   : > { %v335_v18 = vpop.f32.mrf.mxu0 }
  0x99   : > { %v336_v19 = vadd.f32 %v731_v15, %v335_v18 }
  0x9b   : > { %v344_v22 = vmax.f32 %v336_v19, 0.0 }
  0x9d   : > { %v347_v23 = vpack.c.bf16 %v344_v22, %v343_v21 }
  0x9f   : > { %425 = vmatmul.bf16.vlgmr.msra.gmra.mxu1 %v347_v23 }
  0xa0   : > { %v338_v24 = vpop.f32.mrf.mxu0 }
  0xa1   : > { %v339_v25 = vadd.f32 %v731_v15, %v338_v24 }
  0xa3   : > { %v345_v28 = vmax.f32 %v339_v25, 0.0 }
  0xa8   : > { %v340_v26 = vpop.f32.mrf.mxu0 }
  0xa9   : > { %v341_v27 = vadd.f32 %v731_v15, %v340_v26 }
  0xab   : > { %v346_v29 = vmax.f32 %v341_v27, 0.0 }
  0xad   : > { %v348_v30 = vpack.c.bf16 %v346_v29, %v345_v28 }
  0xaf   : > { %430 = vmatmul.bf16.vlgmr.msra.gmra.mxu3 %v348_v30 }
 0x11c   : > { %v426_v35 = vpop.f32.mrf.mxu1 }
 0x11d   : > { %v427_v37 = vadd.f32 %v732_v36, %v426_v35 }
 0x11f   : > { %v436_v40 = vmax.f32 %v427_v37, 0.0 }
 0x124   : > { %v428_v38 = vpop.f32.mrf.mxu1 }
 0x125   : > { %v429_v39 = vadd.f32 %v732_v36, %v428_v38 }
 0x127   : > { %v437_v41 = vmax.f32 %v429_v39, 0.0 }
 0x129   : > { %v440_v42 = vpack.c.bf16 %v437_v41, %v436_v40 }
 0x12b   : > { %518 = vmatmul.bf16.vlgmr.msrb.gmra.mxu0 %v440_v42 }
 0x132   : > { %v431_v43 = vpop.f32.mrf.mxu3 }
 0x133   : > { %v432_v44 = vadd.f32 %v732_v36, %v431_v43 }
 0x135   : > { %v438_v47 = vmax.f32 %v432_v44, 0.0 }
 0x13a   : > { %v433_v45 = vpop.f32.mrf.mxu3 }
 0x13b   : > { %v434_v46 = vadd.f32 %v732_v36, %v433_v45 }
 0x13d   : > { %v439_v48 = vmax.f32 %v434_v46, 0.0 }
 0x13f   : > { %v441_v49 = vpack.c.bf16 %v439_v48, %v438_v47 }
 0x141   : > { %523 = vmatmul.bf16.vlgmr.msra.gmra.mxu2 %v441_v49 }
 0x1a8   : > { %v519_v51 = vpop.f32.mrf.mxu0 }
 0x1a9   : > { %v520_v52 = vadd.f32 %v733_v50, %v519_v51 }
 0x1ab   : > { %v529_v53 = vpack.c.bf16 %v520_v52, %v520_v52 }
 0x1ad   : > { %534 = vst.msk [vmem:[%s280_s11] sm:$0xf] %vm533_vm1, %v529_v53 }
 0x1b0   : > { %v521_v54 = vpop.f32.mrf.mxu0 }
 0x1b1   : > { %v522_v55 = vadd.f32 %v733_v50, %v521_v54 }
 0x1b3   : > { %v530_v56 = vpack.c.bf16 %v522_v55, %v522_v55 }
 0x1b5   : > { %535 = vst.msk [vmem:[%s280_s11 + $0x4] sm:$0xf] %vm533_vm1, %v530_v56 }
 0x1c4   : > { %v524_v57 = vpop.f32.mrf.mxu2 }
 0x1c5   : > { %v525_v58 = vadd.f32 %v733_v50, %v524_v57 }
 0x1c7   : > { %v531_v59 = vpack.c.bf16 %v525_v58, %v525_v58 }
 0x1c9   : > { %536 = vst.msk [vmem:[%s280_s11 + $0x8] sm:$0xf] %vm533_vm1, %v531_v59 }
 0x1cc   : > { %v526_v60 = vpop.f32.mrf.mxu2 }
 0x1cd   : > { %v527_v61 = vadd.f32 %v733_v50, %v526_v60 }
 0x1cf   : > { %v532_v62 = vpack.c.bf16 %v527_v61, %v527_v61 }
 0x1d1   : > { %537 = vst.msk [vmem:[%s280_s11 + $0xc] sm:$0xf] %vm533_vm1, %v532_v62 }
 0x1d2 PF: > { %s17_s24 = sadd.s32 1, %s740_s24  }
 0x1d3   : > { %p14_p4 = scmp.ge.s32.totalorder %s17_s24, 4  }
 0x1d5   :  { %16 = sbr.rel (!%p14_p4) target bundleno = 1 (0x1), region = 78 }

</bundles_post_ra>
